<compile_context>
chip_gen: v5e
topology: v5e:2x2
jax: 0.10.0
libtpu: 0.0.40
codegen_flags: <defaults>
</compile_context>

<pallas_src>
import functools

import jax
import jax.numpy as jnp
from jax.experimental import pallas as pl
from jax.experimental.pallas import tpu as pltpu


_VMEM_LIMIT_BYTES = 48 * 1024 * 1024      # safe on v5e/v6e (128 MiB) and v7x (64 MiB)
_FUSED_SLAB_BYTES = 4 * 1024 * 1024       # per-sample slab cap for the fused path
_PER_BUF_CAP_BYTES = 6 * 1024 * 1024      # per stream buffer cap for the two-pass path


# --------------------------- Fused single-pass kernel ------------------------
def _lpa_fused_kernel(x_ref, wd_ref, bd_ref, wu_ref, bu_ref, out_ref, *, inv_hw):
    x = x_ref[0]                                                     # (C, HW), native dtype
    # Spatial mean, accumulated in f32 (single cross-lane reduce on a resident slab).
    y = jnp.sum(x.astype(jnp.float32), axis=-1, keepdims=True) * inv_hw        # (C, 1)
    # Fused D3/D5/D7 centre-tap projection + ReLU (column-oriented: no relayout).
    d = jnp.maximum(
        jnp.dot(wd_ref[...], y, preferred_element_type=jnp.float32) + bd_ref[...],
        0.0)                                                                    # (3Cr, 1)
    # Fused up-projection + sigmoid.
    s = jax.nn.sigmoid(
        jnp.dot(wu_ref[...], d, preferred_element_type=jnp.float32) + bu_ref[...])  # (C, 1)
    # Scale the resident slab and write once.
    out_ref[0] = (x * s.astype(x.dtype)).astype(out_ref.dtype)


# ------------------- Two-pass fallback: Pass 1 (pooled sum) ------------------
def _lpa_pool_kernel(x_ref, ysum_ref, *, rem):
    t = pl.program_id(1)
    nt = pl.num_programs(1)

    @pl.when(t == 0)
    def _init():
        ysum_ref[...] = jnp.zeros_like(ysum_ref)

    xt = x_ref[0].astype(jnp.float32)                                # (C, THW)
    thw = xt.shape[-1]

    if rem == thw:
        # Evenly divided: plain per-tile reduce folded into the resident (1,C,1) output.
        ysum_ref[...] += jnp.sum(xt, axis=-1, keepdims=True)[None]
    else:
        @pl.when(t < nt - 1)
        def _full_tile():
            ysum_ref[...] += jnp.sum(xt, axis=-1, keepdims=True)[None]

        @pl.when(t == nt - 1)
        def _ragged_tile():
            # Mask the out-of-bounds tail (Pallas pads partial input blocks with
            # unspecified data) so the sum stays exact without host-side padding.
            lane = jax.lax.broadcasted_iota(jnp.int32, xt.shape, dimension=1)
            xm = jnp.where(lane < rem, xt, 0.0)
            ysum_ref[...] += jnp.sum(xm, axis=-1, keepdims=True)[None]


# ------------------- Two-pass fallback: Pass 2 (x * s) -----------------------
def _lpa_scale_kernel(x_ref, s_ref, out_ref):
    # s block is (1, C, 1): C on sublanes -> cheap lane broadcast.
    # Out-of-bounds lanes of a ragged last tile are dropped by the write-back DMA.
    out_ref[...] = x_ref[...] * s_ref[...]


# ------------------------------- helpers --------------------------------------
def _round_up(a, b):
    return (a + b - 1) // b * b


def _choose_tile(hw, c, itemsize):
    """Lane-dense (multiple-of-128) spatial tile for the streaming fallback.

    Pass 2 double-buffers both input and output (4 stream buffers), so a
    ~6 MiB per-buffer cap stays well inside the 48 MiB scoped VMEM we request
    on every TPU generation (and inside v7x's 64 MiB physical VMEM).
    """
    max_thw = max(128, (_PER_BUF_CAP_BYTES // (c * itemsize)) // 128 * 128)
    return int(min(_round_up(hw, 128), max_thw))


# -------------------------------- wrapper --------------------------------------
def lpa_forward(x, params, *, force_two_pass=False, tile_hw=None, donate_x=False):
    """x: (N, C, H, W); params: dict with wd/bd/wu/bu (fused centre taps).

    Output dtype matches x.dtype (matches the PyTorch module).
    """
    N, C, H, W = x.shape
    HW = H * W
    dtype = x.dtype
    x_flat = x.reshape(N, C, HW)                       # no copy, no dtype cast

    wd, bd, wu, bu = params["wd"], params["bd"], params["wu"], params["bu"]
    Cr3 = wd.shape[0]

    io_alias = {0: 0} if donate_x else {}
    slab_bytes = C * HW * jnp.dtype(dtype).itemsize

    # ----------------- Fused single-pass path (2x HBM traffic) -----------------
    if slab_bytes <= _FUSED_SLAB_BYTES and not force_two_pass:
        out = pl.pallas_call(
            functools.partial(_lpa_fused_kernel, inv_hw=float(1.0 / HW)),
            out_shape=jax.ShapeDtypeStruct((N, C, HW), dtype),
            grid_spec=pltpu.PrefetchScalarGridSpec(
                num_scalar_prefetch=0,
                grid=(N,),
                in_specs=[
                    pl.BlockSpec((1, C, HW), lambda n: (n, 0, 0)),
                    # weights/biases: constant index maps -> DMA'd once, resident
                    pl.BlockSpec((Cr3, C), lambda n: (0, 0)),
                    pl.BlockSpec((Cr3, 1), lambda n: (0, 0)),
                    pl.BlockSpec((C, Cr3), lambda n: (0, 0)),
                    pl.BlockSpec((C, 1), lambda n: (0, 0)),
                ],
                out_specs=pl.BlockSpec((1, C, HW), lambda n: (n, 0, 0)),
            ),
            compiler_params=pltpu.CompilerParams(
                dimension_semantics=("parallel",),
                vmem_limit_bytes=_VMEM_LIMIT_BYTES),
            input_output_aliases=io_alias,
        )(x_flat, wd, bd, wu, bu)
        return out.reshape(N, C, H, W)

    # --------------------- Two-pass streaming fallback --------------------------
    itemsize = jnp.dtype(dtype).itemsize
    THW = int(tile_hw) if tile_hw is not None else _choose_tile(HW, C, itemsize)
    num_t = int(pl.cdiv(HW, THW))
    rem = HW - (num_t - 1) * THW                       # size of the (possibly ragged) tail

    # Pass 1: pooled spatial sum per (n, c)  -> (N, C, 1) f32
    ysum = pl.pallas_call(
        functools.partial(_lpa_pool_kernel, rem=rem),
        out_shape=jax.ShapeDtypeStruct((N, C, 1), jnp.float32),
        grid_spec=pltpu.PrefetchScalarGridSpec(
            num_scalar_prefetch=0,
            grid=(N, num_t),
            in_specs=[pl.BlockSpec((1, C, THW), lambda n, t: (n, 0, t))],
            out_specs=pl.BlockSpec((1, C, 1), lambda n, t: (n, 0, 0)),
        ),
        compiler_params=pltpu.CompilerParams(
            dimension_semantics=("parallel", "arbitrary"),
            vmem_limit_bytes=_VMEM_LIMIT_BYTES),
    )(x_flat)

    # Tiny MLP batched over N in plain JAX (off the per-n pipeline critical path).
    y = ysum[:, :, 0] * (1.0 / HW)                                    # (N, C)   f32
    d = jax.nn.relu(y @ wd.T + bd[:, 0])                              # (N, 3Cr)
    s = jax.nn.sigmoid(d @ wu.T + bu[:, 0])                           # (N, C)
    s = s.astype(dtype)[:, :, None]                                   # (N, C, 1)

    # Pass 2: fully parallel, lane-dense streamed x * s.
    out = pl.pallas_call(
        _lpa_scale_kernel,
        out_shape=jax.ShapeDtypeStruct((N, C, HW), dtype),
        grid_spec=pltpu.PrefetchScalarGridSpec(
            num_scalar_prefetch=0,
            grid=(N, num_t),
            in_specs=[
                pl.BlockSpec((1, C, THW), lambda n, t: (n, 0, t)),
                pl.BlockSpec((1, C, 1), lambda n, t: (n, 0, 0)),
            ],
            out_specs=pl.BlockSpec((1, C, THW), lambda n, t: (n, 0, t)),
        ),
        compiler_params=pltpu.CompilerParams(
            dimension_semantics=("parallel", "parallel"),
            vmem_limit_bytes=_VMEM_LIMIT_BYTES),
        input_output_aliases=io_alias,
    )(x_flat, s)

    return out.reshape(N, C, H, W)


# ------------------------- deterministic init ----------------------------------
def init_lpa_params(key, channel, reduction=16):
    cr = channel // reduction
    ks = jax.random.split(key, 8)

    def kaiming(k, out_c, in_c, ksz=3):
        # torch.nn.init.kaiming_normal_ default: fan_in, gain = sqrt(2)
        fan_in = in_c * ksz * ksz
        std = (2.0 / fan_in) ** 0.5
        return std * jax.random.normal(k, (out_c, in_c, ksz, ksz), jnp.float32)

    def conv_bias(k, out_c, in_c, ksz=3):
        # PyTorch Conv2d default bias init: U(-1/sqrt(fan_in), 1/sqrt(fan_in))
        bound = 1.0 / (in_c * ksz * ksz) ** 0.5
        return jax.random.uniform(k, (out_c,), jnp.float32, -bound, bound)

    W3 = kaiming(ks[0], cr, channel); b3 = conv_bias(ks[1], cr, channel)
    W5 = kaiming(ks[2], cr, channel); b5 = conv_bias(ks[3], cr, channel)
    W7 = kaiming(ks[4], cr, channel); b7 = conv_bias(ks[5], cr, channel)
    Wup = kaiming(ks[6], channel, 3 * cr); bup = conv_bias(ks[7], channel, 3 * cr)

    # Centre taps only (exact on a 1x1 pooled map, see note at top); fuse the
    # three branch convs into a single (3Cr, C) matrix, up-conv as (C, 3Cr).
    wd = jnp.concatenate(
        [W3[:, :, 1, 1], W5[:, :, 1, 1], W7[:, :, 1, 1]], axis=0)   # (3Cr, C)
    bd = jnp.concatenate([b3, b5, b7], axis=0).reshape(3 * cr, 1)   # (3Cr, 1)
    wu = Wup[:, :, 1, 1]                                            # (C, 3Cr)
    bu = bup.reshape(channel, 1)                                    # (C, 1)
    return dict(wd=wd, bd=bd, wu=wu, bu=bu)


# -------------------------- pure-JAX reference ----------------------------------
def lpa_reference(x, params):
    y = jnp.mean(x.astype(jnp.float32), axis=(2, 3))                # (N, C)
    d = jax.nn.relu(y @ params["wd"].T + params["bd"][:, 0])        # (N, 3Cr)
    z = d @ params["wu"].T + params["bu"][:, 0]                     # (N, C)
    s = jax.nn.sigmoid(z)
    return (x * s.astype(x.dtype)[:, :, None, None]).astype(x.dtype)


if __name__ == "__main__":
    key = jax.random.PRNGKey(0)
    k_x, k_p, k_x2 = jax.random.split(key, 3)

    # channel=64, reduction=16 -> Cr=4, 3Cr=12
    N, C, H, W = 2, 64, 16, 16
    x = jax.random.normal(k_x, (N, C, H, W), jnp.float32)
    params = init_lpa_params(k_p, C, reduction=16)

    # 1) Fused single-pass path (per-sample slab fits VMEM).
    out = lpa_forward(x, params)
    jax.block_until_ready(out)
    ref = lpa_reference(x, params)
    assert out.shape == (N, C, H, W)
    assert out.dtype == x.dtype
    assert jnp.allclose(out, ref, atol=1e-5, rtol=1e-5), "fused path mismatch"

    # 2) Two-pass streaming fallback, forced, with a ragged spatial tail
    #    (HW = 576, tile = 256 -> last tile has only 64 valid lanes).
    x2 = jax.random.normal(k_x2, (1, C, 24, 24), jnp.float32)
    out2 = lpa_forward(x2, params, force_two_pass=True, tile_hw=256)
    jax.block_until_ready(out2)
    ref2 = lpa_reference(x2, params)
    assert jnp.allclose(out2, ref2, atol=1e-5, rtol=1e-5), "two-pass path mismatch"

    print("KERNEL_OK")
</pallas_src>

<mosaic_0001>
module attributes {stable_mosaic.version = 11 : i64} {
  func.func @_lpa_fused_kernel(%arg0: i32, %arg1: memref<1x64x256xf32, #tpu.memory_space<vmem>>, %arg2: memref<12x64xf32, #tpu.memory_space<vmem>>, %arg3: memref<12x1xf32, #tpu.memory_space<vmem>>, %arg4: memref<64x12xf32, #tpu.memory_space<vmem>>, %arg5: memref<64x1xf32, #tpu.memory_space<vmem>>, %arg6: memref<1x64x256xf32, #tpu.memory_space<vmem>>) attributes {dimension_semantics = [#tpu.dimension_semantics<parallel>], iteration_bounds = array<i64: 2>, scalar_prefetch = 0 : i64, scratch_operands = 0 : i64, tpu.core_type = #tpu.core_type<tc>, window_params = [{transform_indices = @transform_0, window_bounds = array<i64: 1, 64, 256>}, {pipeline_mode = #tpu.pipeline_mode<synchronous>, transform_indices = @transform_1, window_bounds = array<i64: 12, 64>}, {pipeline_mode = #tpu.pipeline_mode<synchronous>, transform_indices = @transform_2, window_bounds = array<i64: 12, 1>}, {pipeline_mode = #tpu.pipeline_mode<synchronous>, transform_indices = @transform_3, window_bounds = array<i64: 64, 12>}, {pipeline_mode = #tpu.pipeline_mode<synchronous>, transform_indices = @transform_4, window_bounds = array<i64: 64, 1>}, {transform_indices = @transform_5, window_bounds = array<i64: 1, 64, 256>}]} {
    %c0 = arith.constant 0 : index
    %c0_0 = arith.constant 0 : index
    %c0_1 = arith.constant 0 : index
    %0 = vector.load %arg1[%c0, %c0_0, %c0_1] : memref<1x64x256xf32, #tpu.memory_space<vmem>>, vector<1x64x256xf32>
    %1 = vector.shape_cast %0 : vector<1x64x256xf32> to vector<64x256xf32>
    %cst = arith.constant dense<0.000000e+00> : vector<64xf32>
    %2 = vector.multi_reduction <add>, %1, %cst [1] : vector<64x256xf32> to vector<64xf32>
    %3 = vector.shape_cast %2 : vector<64xf32> to vector<64x1xf32>
    %cst_2 = arith.constant 3.906250e-03 : f32
    %4 = vector.broadcast %cst_2 : f32 to vector<64x1xf32>
    %5 = arith.mulf %3, %4 : vector<64x1xf32>
    %c0_3 = arith.constant 0 : index
    %c0_4 = arith.constant 0 : index
    %6 = vector.load %arg2[%c0_3, %c0_4] : memref<12x64xf32, #tpu.memory_space<vmem>>, vector<12x64xf32>
    %cst_5 = arith.constant dense<0.000000e+00> : vector<12x1xf32>
    %7 = tpu.matmul %6, %5, %cst_5 {dimension_numbers = #tpu.dot_dimension_numbers<[1], [0], [0], [1], [0, 0, 1, 1], [], []>} : vector<12x64xf32>, vector<64x1xf32>, vector<12x1xf32> -> vector<12x1xf32>
    %c0_6 = arith.constant 0 : index
    %c0_7 = arith.constant 0 : index
    %8 = vector.load %arg3[%c0_6, %c0_7] : memref<12x1xf32, #tpu.memory_space<vmem>>, vector<12x1xf32>
    %9 = arith.addf %7, %8 : vector<12x1xf32>
    %cst_8 = arith.constant 0.000000e+00 : f32
    %10 = vector.broadcast %cst_8 : f32 to vector<12x1xf32>
    %11 = arith.maximumf %9, %10 : vector<12x1xf32>
    %c0_9 = arith.constant 0 : index
    %c0_10 = arith.constant 0 : index
    %12 = vector.load %arg4[%c0_9, %c0_10] : memref<64x12xf32, #tpu.memory_space<vmem>>, vector<64x12xf32>
    %cst_11 = arith.constant dense<0.000000e+00> : vector<64x1xf32>
    %13 = tpu.matmul %12, %11, %cst_11 {dimension_numbers = #tpu.dot_dimension_numbers<[1], [0], [0], [1], [0, 0, 1, 1], [], []>} : vector<64x12xf32>, vector<12x1xf32>, vector<64x1xf32> -> vector<64x1xf32>
    %c0_12 = arith.constant 0 : index
    %c0_13 = arith.constant 0 : index
    %14 = vector.load %arg5[%c0_12, %c0_13] : memref<64x1xf32, #tpu.memory_space<vmem>>, vector<64x1xf32>
    %15 = arith.addf %13, %14 : vector<64x1xf32>
    %16 = arith.negf %15 : vector<64x1xf32>
    %17 = math.exp %16 : vector<64x1xf32>
    %cst_14 = arith.constant 1.000000e+00 : f32
    %18 = vector.broadcast %cst_14 : f32 to vector<64x1xf32>
    %19 = arith.addf %18, %17 : vector<64x1xf32>
    %20 = arith.divf %18, %19 : vector<64x1xf32>
    %21 = vector.broadcast %20 : vector<64x1xf32> to vector<64x256xf32>
    %22 = arith.mulf %1, %21 : vector<64x256xf32>
    %c0_15 = arith.constant 0 : index
    %c0_16 = arith.constant 0 : index
    %c0_17 = arith.constant 0 : index
    %23 = vector.load %arg6[%c0_15, %c0_16, %c0_17] : memref<1x64x256xf32, #tpu.memory_space<vmem>>, vector<1x64x256xf32>
    %24 = vector.shape_cast %23 : vector<1x64x256xf32> to vector<64x256xf32>
    %25 = vector.shape_cast %22 : vector<64x256xf32> to vector<1x64x256xf32>
    tpu.vector_store %arg6[%c0_15, %c0_16, %c0_17], %25 {strides = array<i32>} : memref<1x64x256xf32, #tpu.memory_space<vmem>>, vector<1x64x256xf32>,
    return
  }
  func.func @transform_0(%arg0: i32) -> (i32, i32, i32) {
    %c0_i32 = arith.constant 0 : i32
    %c0_i32_0 = arith.constant 0 : i32
    %c0_i32_1 = arith.constant 0 : i32
    return %arg0, %c0_i32, %c0_i32_0 : i32, i32, i32
  }
  func.func @transform_1(%arg0: i32) -> (i32, i32) {
    %c0_i32 = arith.constant 0 : i32
    %c0_i32_0 = arith.constant 0 : i32
    %c0_i32_1 = arith.constant 0 : i32
    return %c0_i32, %c0_i32_0 : i32, i32
  }
  func.func @transform_2(%arg0: i32) -> (i32, i32) {
    %c0_i32 = arith.constant 0 : i32
    %c0_i32_0 = arith.constant 0 : i32
    %c0_i32_1 = arith.constant 0 : i32
    return %c0_i32, %c0_i32_0 : i32, i32
  }
  func.func @transform_3(%arg0: i32) -> (i32, i32) {
    %c0_i32 = arith.constant 0 : i32
    %c0_i32_0 = arith.constant 0 : i32
    %c0_i32_1 = arith.constant 0 : i32
    return %c0_i32, %c0_i32_0 : i32, i32
  }
  func.func @transform_4(%arg0: i32) -> (i32, i32) {
    %c0_i32 = arith.constant 0 : i32
    %c0_i32_0 = arith.constant 0 : i32
    %c0_i32_1 = arith.constant 0 : i32
    return %c0_i32, %c0_i32_0 : i32, i32
  }
  func.func @transform_5(%arg0: i32) -> (i32, i32, i32) {
    %c0_i32 = arith.constant 0 : i32
    %c0_i32_0 = arith.constant 0 : i32
    %c0_i32_1 = arith.constant 0 : i32
    return %arg0, %c0_i32, %c0_i32_0 : i32, i32, i32
  }
}

</mosaic_0001>

<bundles_post_ra>
// kernel: tpu_custom_call.1
= control target key start
LH: loop header
LB: loop body
LE: loop exit
PB: predicated region body
PF: predicated region fallthrough
CT: control target
= control target key end

     0   :  { %10 = vsyncpa [#allocation3], 0  ;;  %s1332_s0 = inlined_call_operand.hbm [shape: f32[2,64,256], index: 0, kind: input, shape index: {}]   ;;  %s1333_s1 = inlined_call_operand.vmem [shape: f32[12,64], index: 1, kind: input, shape index: {}]   ;;  %s1334_s2 = inlined_call_operand.vmem [shape: f32[12,1], index: 2, kind: input, shape index: {}]   ;;  %s1335_s3 = inlined_call_operand.vmem [shape: f32[64,12], index: 3, kind: input, shape index: {}]   ;;  %s1336_s4 = inlined_call_operand.vmem [shape: f32[64,1], index: 4, kind: input, shape index: {}]   ;;  %s1337_s5 = inlined_call_operand.hbm [shape: f32[2,64,256], index: 5, kind: output, shape index: {}]  }
   0x1   :  { %12 = vsyncpa [#allocation3 + $0x1], 0 }
   0x2   :  { %13 = vsyncpa [#allocation4], 0 }
   0x3   :  { %15 = vsyncpa [#allocation4 + $0x1], 0  ;;  %s986_s18 = smov 0   ;;  %s988_s19 = smov 0  }
   0x4   :  { %s990_s20 = smov 0   ;;  %s992_s21 = smov 0  }
   0x5 LB: > { %s1007_s22 = sadd.s32 4294967295, %s949_s21   ;;  %s728_s23 = sadd.s32 4294967294, %s949_s21   ;;  %s949_s21 = sphi %s992_s21, %s1349_s21   ;;  %s945_s20 = sphi %s990_s20, %s1348_s20   ;;  %s941_s19 = sphi %s988_s19, %s1347_s19   ;;  %s937_s18 = sphi %s986_s18, %s1346_s18  }
   0x6   : > { %s1011_s24 = sadd.s32 1, %s949_s21   ;;  %s28_s25 = sadd.s32 1, %s945_s20 }
   0x7   : > { %s25_s26 = ssub.s32 %s949_s21, %s1011_s24  ;;  %p35_p0 = scmp.ne.s32.totalorder %s945_s20, %s941_s19 }
   0x8   : > { %p26_p1 = scmp.eq.s32.totalorder %s25_s26, 0  ;;  %p36_p2 = scmp.eq.s32.totalorder %s949_s21, 0 }
   0x9   : > { %p41_p3 = scmp.ne.s32.totalorder %s941_s19, %s937_s18  ;;  %p42_p4 = scmp.eq.s32.totalorder %s1007_s22, 0 }
   0xa   : > { %s1023_s27 = scalar_select %p26_p1, %s945_s20, %s28_s25  }
   0xb   : > { %p1025_p5 = por %p36_p2, %p35_p0  ;;  %p1029_p6 = por %p42_p4, %p41_p3 }
   0xc   : > { %p149_p7 = scmp.eq.s32.totalorder %s1007_s22, 1  ;;  %p155_p8 = scmp.eq.s32.totalorder %s728_s23, 1 }
   0xd   : > { %p779_p10 = scmp.lt.s32.totalorder %s949_s21, 2  ;;  %s187_s7 = sand.u32 1, %s945_s20  }
   0xe   : > { %p1036_p11 = por %p149_p7, %p35_p0  ;;  %p1040_p12 = por %p155_p8, %p41_p3 }
   0xf   : > { %s761_s8 = sshll.u32 %s949_s21, 7  ;;  %s731_s9 = sshll.u32 %s187_s7, 7 }
  0x10   : > { %s196_s12 = scalar_lea.hbm %s1332_s0, %s761_s8  ;;  %s191_s14 = scalar_lea.vmem [#allocation2], %s731_s9 }
  0x11   : > { %s197_s13 = sshll.u32 %s196_s12, 4  ;;  %s199_s15 = sshll.u32 %s191_s14, 4  ;;  %s198_s13 = int_to_ptr.hbm [resolvable:$true] %s197_s13  ;;  %s200_s15 = int_to_ptr.vmem [resolvable:$true] %s199_s15 }
  0x12   : > { %p1051_p13 = pnand %p779_p10, %p1025_p5  ;;  %p734_p0 = scmp.ge.s32.totalorder %s949_s21, 1 }
  0x13   : > { %p207_p1 = scmp.lt.s32.totalorder %s949_s21, 3  ;;  %s188_s17 = scalar_lea.sflag [#allocation3], %s187_s7 }
  0x14   : > { %s853_s23 = sshra.s32 %s198_s13, 4  ;;  %p857_p3 = pneg %p1051_p13  ;;  %s854_s23 = int_to_ptr.hbm [resolvable:$true] %s853_s23 }
  0x15   : > { %s855_s25 = scalar_lea.hbm %s854_s23, 128  ;;  %s860_s28 = scalar_lea.hbm %s1332_s0, 256 }
  0x16   : > { %p856_p2 = scmp.ne.s32.totalorder %s854_s23, %s855_s25  ;;  %p861_p5 = scmp.lt.s32.totalorder %s854_s23, %s1332_s0 }
  0x17   : > { %p862_p8 = scmp.lt.s32.totalorder %s860_s28, %s855_s25 }
  0x18   : > { %p858_p4 = pnand %p857_p3, %p856_p2 }
  0x19   : > { %p863_p10 = por %p862_p8, %p861_p5 }
  0x1a   : > { %p859_p7 = pneg %p858_p4 }
  0x1c   : > { %p864_p9 = pnand %p863_p10, %p859_p7 }
  0x1e   : > { %867 = shalt.err (!%p864_p9)
}
  0x1f   : > { %s951_s7 = smov 256   ;;  %s952_s11 = smov 16  }
  0x20   : > { %774 = dma.hbm_to_vmem [thread:$0]  (!%p1051_p13), %s198_s13, 2048, %s200_s15, %s188_s17, %s951_s7, %s951_s7, %s952_s11  }
  0x21   : > { %p208_p2 = pnand %p734_p0, %p207_p1 }
  0x22   : > { %s1072_s12 = sand.u32 (!%p208_p2), 1, %s941_s19  }
  0x23   : > { %211 = sbr.rel (%p208_p2) target bundleno = 636 (0x27c), region = 40  ;;  %s735_s14 = sshll.u32 (!%p208_p2), %s1072_s12, 7 }
  0x24   : > { %s214_s23 = scalar_lea.sflag (!%p208_p2), [#allocation3], %s1072_s12  ;;  %s217_s25 = scalar_lea.vmem (!%p208_p2), [#allocation2], %s735_s14 }
  0x28   : > { %928 = dma.done.wait (%p1029_p6), %s214_s23, 2048  }
  0x29   : > { %930 = vsyncadd (%p1029_p6), %s214_s23, 4294965248  ;;  %v1082_v0 = vld [vmem:[%s217_s25 + $0x70] sm:$0xff]  ;;  %v1084_v1 = vld [vmem:[%s217_s25 + $0x78] sm:$0xff]  ;;  %vm297_vm0 = vcmask 523264   ;;  %vm370_vm1 = vcmask 1043456   ;;  %vm345_vm2 = vcmask 97280  }
  0x2a   : > { %v1086_v2 = vld [vmem:[%s217_s25 + $0x50] sm:$0xff]  ;;  %v282_v3 = vadd.f32 %v1084_v1, %v1082_v0  ;;  %v1090_v4 = vld [vmem:[%s217_s25 + $0x58] sm:$0xff]  ;;  %v1100_v9 = vld [vmem:[%s217_s25 + $0x60] sm:$0xff]  ;;  %v953_v60 = vmov 0   ;;  %s1266_s23 = scalar_lea.vmem [#allocation5], %s735_s14  ;;  %s762_s14 = sshll.u32 %s1007_s22, 7 }
  0x2b   : > { %v276_v5 = vadd.f32 %v1090_v4, %v1086_v2  ;;  %v1094_v6 = vld [vmem:[%s217_s25 + $0x30] sm:$0xff]  ;;  %v1096_v7 = vld [vmem:[%s217_s25 + $0x38] sm:$0xff]  ;;  %v1102_v10 = vld [vmem:[%s217_s25 + $0x68] sm:$0xff]  ;;  %818 = vset.pattern.permute.xlu2 %v953_v60  ;;  %819 = vset.pattern.permute.xlu0 %v953_v60  ;;  %s651_s13 = scalar_lea.hbm %s1337_s5, %s762_s14  ;;  %s652_s15 = sshll.u32 %s1266_s23, 4  ;;  %s653_s15 = int_to_ptr.vmem [resolvable:$true] %s652_s15 }
  0x2c   : > { %283 = vadd.xlane.f32.xlu0 %v282_v3  ;;  %v270_v8 = vadd.f32 %v1096_v7, %v1094_v6  ;;  %v1104_v11 = vld [vmem:[%s217_s25 + $0x40] sm:$0xff]  ;;  %v1106_v12 = vld [vmem:[%s217_s25 + $0x48] sm:$0xff]  ;;  %v279_v15 = vadd.f32 %v1102_v10, %v1100_v9  ;;  %v1118_v18 = vld [vmem:[%s217_s25 + $0x10] sm:$0xff]  ;;  %820 = vset.pattern.permute.xlu1 %v953_v60  ;;  %s654_s16 = sshll.u32 %s651_s13, 4  ;;  %s640_s22 = scalar_lea.sflag [#allocation4], %s1072_s12  ;;  %s655_s16 = int_to_ptr.hbm [resolvable:$true] %s654_s16 }
  0x2d   : > { %277 = vadd.xlane.f32.xlu1 %v276_v5  ;;  %v1108_v13 = vld [vmem:[%s217_s25 + $0x20] sm:$0xff]  ;;  %v1110_v14 = vld [vmem:[%s217_s25 + $0x28] sm:$0xff]  ;;  %v273_v16 = vadd.f32 %v1106_v12, %v1104_v11  ;;  %v1120_v19 = vld [vmem:[%s217_s25 + $0x18] sm:$0xff]  ;;  %s897_s17 = sshra.s32 %s655_s16, 4  ;;  %s903_s9 = scalar_lea.hbm %s1337_s5, 256  ;;  %s898_s17 = int_to_ptr.hbm [resolvable:$true] %s897_s17 }
  0x2e   : > { %271 = vadd.xlane.f32.xlu2 %v270_v8  ;;  %v267_v17 = vadd.f32 %v1110_v14, %v1108_v13  ;;  %v1122_v20 = vld [vmem:[%s217_s25] sm:$0xff]  ;;  %v1124_v21 = vld [vmem:[%s217_s25 + $0x8] sm:$0xff]  ;;  %v264_v22 = vadd.f32 %v1120_v19, %v1118_v18  ;;  %v332_v51 = vld [vmem:[%s1335_s3 + $0x18] sm:$0xff]  ;;  %s899_s26 = scalar_lea.hbm %s898_s17, 128  ;;  %p904_p0 = scmp.lt.s32.totalorder %s898_s17, %s1337_s5 }
  0x2f   : > { %v261_v23 = vadd.f32 %v1124_v21, %v1122_v20  ;;  %v293_v40 = vld [vmem:[%s1333_s1] sm:$0xff]  ;;  %v294_v41 = vld [vmem:[%s1333_s1 + $0x8] sm:$0xf]  ;;  %v335_v52 = vld [vmem:[%s1335_s3 + $0x30] sm:$0xff]  ;;  %p900_p6 = scmp.ne.s32.totalorder %s898_s17, %s899_s26  ;;  %p905_p1 = scmp.lt.s32.totalorder %s903_s9, %s899_s26 }
  0x30   : > { %v295_v43 = vld [vmem:[%s1334_s2] sm:$0xff]  ;;  %v296_v44 = vld [vmem:[%s1334_s2 + $0x8] sm:$0xf]  ;;  %v336_v55 = vld [vmem:[%s1335_s3 + $0x38] sm:$0xff] }
  0x31   : > { %v329_v50 = vld [vmem:[%s1335_s3] sm:$0xff]  ;;  %v330_v53 = vld [vmem:[%s1335_s3 + $0x8] sm:$0xff]  ;;  %v331_v56 = vld [vmem:[%s1335_s3 + $0x10] sm:$0xff]  ;;  %p901_p9 = pnand %p900_p6, %p1036_p11  ;;  %p906_p3 = por %p905_p1, %p904_p0 }
  0x32   : > { %v333_v54 = vld [vmem:[%s1335_s3 + $0x20] sm:$0xff]  ;;  %v334_v57 = vld [vmem:[%s1335_s3 + $0x28] sm:$0xff]  ;;  %v340_v63 = vld [vmem:[%s1336_s4 + $0x18] sm:$0xff] }
  0x33   : > { %v337_v58 = vld [vmem:[%s1336_s4] sm:$0xff]  ;;  %v343_v3 = vld [vmem:[%s1336_s4 + $0x30] sm:$0xff]  ;;  %v338_v5 = vld [vmem:[%s1336_s4 + $0x8] sm:$0xff]  ;;  %p902_p13 = pneg %p901_p9 }
  0x34   : > { %280 = vadd.xlane.f32.xlu0 %v279_v15 }
  0x35   : > { %274 = vadd.xlane.f32.xlu1 %v273_v16  ;;  %p907_p4 = pnand %p906_p3, %p902_p13 }
  0x36   : > { %268 = vadd.xlane.f32.xlu2 %v267_v17 }
  0x3c   : > { %265 = vadd.xlane.f32.xlu0 %v264_v22 }
  0x3d   : > { %262 = vadd.xlane.f32.xlu1 %v261_v23 }
  0x9f   : > { %v284_v24 = vpop.xlane.xlu0 %283 }
  0xa0   : > { %v292_v25 = vmul.f32 0.00390625, %v284_v24  ;;  %v278_v26 = vpop.xlane.xlu1 %277 }
  0xa1   : > { %v272_v27 = vpop.xlane.xlu2 %271  ;;  %v290_v31 = vmul.f32 0.00390625, %v278_v26 }
  0xa2   : > { %312 = vmatpush.msra.mxu0 %v292_v25  ;;  %v288_v34 = vmul.f32 0.00390625, %v272_v27 }
  0xa7   : > { %v281_v28 = vpop.xlane.xlu0 %280 }
  0xa8   : > { %v291_v29 = vmul.f32 0.00390625, %v281_v28  ;;  %v275_v30 = vpop.xlane.xlu1 %274 }
  0xa9   : > { %v289_v32 = vmul.f32 0.00390625, %v275_v30  ;;  %v269_v33 = vpop.xlane.xlu2 %268  ;;  %v339_v30 = vld [vmem:[%s1336_s4 + $0x10] sm:$0xff] }
  0xaa   : > { %313 = vmatpush.msra.mxu0 %v291_v29  ;;  %v287_v35 = vmul.f32 0.00390625, %v269_v33  ;;  %v341_v29 = vld [vmem:[%s1336_s4 + $0x20] sm:$0xff] }
  0xac   : > { %314 = vmatpush.msra.mxu0 %v290_v31  ;;  %v344_v31 = vld [vmem:[%s1336_s4 + $0x38] sm:$0xff] }
  0xae   : > { %315 = vmatpush.msra.mxu0 %v289_v32 }
  0xaf   : > { %v266_v36 = vpop.xlane.xlu0 %265 }
  0xb0   : > { %316 = vmatpush.msra.mxu0 %v288_v34  ;;  %v286_v37 = vmul.f32 0.00390625, %v266_v36  ;;  %v263_v38 = vpop.xlane.xlu1 %262 }
  0xb1   : > { %v285_v39 = vmul.f32 0.00390625, %v263_v38 }
  0xb2   : > { %317 = vmatpush.msra.mxu0 %v287_v35 }
  0xb4   : > { %318 = vmatpush.msra.mxu0 %v286_v37 }
  0xb6   : > { %319 = vmatpush.msra.mxu0 %v285_v39 }
  0xb7   : > { %737 = vmatmul.msk.f32.vlgmr.msra.gmra.mxu0 %vm297_vm0, %v293_v40 }
  0xbf   : > { %738 = vmatmul.msk.f32.gmra.mxu0 %vm297_vm0, %v294_v41 }
 0x134   : > { %v321_v42 = vpop.f32.mrf.mxu0 }
 0x135   : > { %v322_v46 = vadd.f32 %v321_v42, %v295_v43 }
 0x137   : > { %v327_v49 = vmax.f32 %v322_v46, 0.0 }
 0x13c   : > { %v324_v45 = vpop.f32.mrf.mxu0 }
 0x13d   : > { %v325_v47 = vadd.f32 %v324_v45, %v296_v44 }
 0x13f   : > { %v328_v48 = vmax.f32 %v325_v47, 0.0  ;;  %v342_v47 = vld [vmem:[%s1336_s4 + $0x28] sm:$0xff] }
 0x141   : > { %739 = vmatpush.msk.msra.mxu1 %vm370_vm1, %v328_v48  ;;  %763 = vmatpush.msk.msra.mxu2 %vm370_vm1, %v328_v48 }
 0x142   : > { %764 = vmatpush.msk.msra.mxu3 %vm370_vm1, %v328_v48 }
 0x143   : > { %389 = vmatpush.msra.mxu1 %v327_v49  ;;  %765 = vmatpush.msra.mxu2 %v327_v49 }
 0x144   : > { %766 = vmatpush.msra.mxu3 %v327_v49  ;;  %740 = vmatmul.msk.f32.vlgmr.msra.gmra.mxu1 %vm345_vm2, %v329_v50 }
 0x145   : > { %743 = vmatmul.msk.f32.vlgmr.msra.gmra.mxu2 %vm345_vm2, %v332_v51  ;;  %746 = vmatmul.msk.f32.vlgmr.msra.gmra.mxu3 %vm345_vm2, %v335_v52 }
 0x14c   : > { %741 = vmatmul.msk.f32.gmra.mxu1 %vm345_vm2, %v330_v53 }
 0x14d   : > { %744 = vmatmul.msk.f32.gmra.mxu2 %vm345_vm2, %v333_v54  ;;  %747 = vmatmul.msk.f32.gmra.mxu3 %vm345_vm2, %v336_v55 }
 0x154   : > { %742 = vmatmul.msk.f32.gmra.mxu1 %vm345_vm2, %v331_v56 }
 0x155   : > { %745 = vmatmul.msk.f32.gmra.mxu2 %vm345_vm2, %v334_v57 }
 0x1c1   : > { %v391_v59 = vpop.f32.mrf.mxu1 }
 0x1c2   : > { %v392_v61 = vadd.f32 %v391_v59, %v337_v58 }
 0x1c4   : > { %v748_v62 = vmul.f32 -1.442695, %v392_v61 }
 0x1c6   : > { %821 = vpow2.f32 %v748_v62 }
 0x1c8   : > { %v400_v8 = vpop.f32.mrf.mxu2  ;;  %v409_v15 = vpop.f32.mrf.mxu3 }
 0x1c9   : > { %v401_v16 = vadd.f32 %v400_v8, %v340_v63  ;;  %v394_v17 = vpop.f32.mrf.mxu1  ;;  %v410_v22 = vadd.f32 %v409_v15, %v343_v3 }
 0x1ca   : > { %v395_v23 = vadd.f32 %v394_v17, %v338_v5 }
 0x1cb   : > { %v751_v24 = vmul.f32 -1.442695, %v401_v16  ;;  %v754_v27 = vmul.f32 -1.442695, %v410_v22 }
 0x1cc   : > { %v822_v25 = vpop.eup %821  ;;  %v749_v26 = vmul.f32 -1.442695, %v395_v23 }
 0x1cd   : > { %v439_v28 = vadd.f32 1.0, %v822_v25  ;;  %823 = vpow2.f32 %v751_v24 }
 0x1ce   : > { %825 = vpow2.f32 %v749_v26 }
 0x1cf   : > { %827 = vrcp.f32 %v439_v28  ;;  %v458_v53 = vand.u32 2147483648, %v439_v28  ;;  %v456_v55 = vand.u32 2147483647, %v439_v28  ;;  %vm452_vm4 = vweird.f32 %v439_v28 }
 0x1d0   : > { %829 = vpow2.f32 %v754_v27  ;;  %v403_v32 = vpop.f32.mrf.mxu2  ;;  %v412_v33 = vpop.f32.mrf.mxu3 }
 0x1d1   : > { %v404_v34 = vadd.f32 %v403_v32, %v341_v29  ;;  %v397_v35 = vpop.f32.mrf.mxu1  ;;  %v413_v37 = vadd.f32 %v412_v33, %v344_v31  ;;  %v459_v62 = vor.u32 1.1754944e-38, %v458_v53  ;;  %vm457_vm6 = vcmp.eq.f32.partialorder %v456_v55, 8.507059e+37 }
 0x1d2   : > { %v398_v36 = vadd.f32 %v397_v35, %v339_v30 }
 0x1d3   : > { %v824_v38 = vpop.eup %823  ;;  %v752_v39 = vmul.f32 -1.442695, %v404_v34  ;;  %v755_v46 = vmul.f32 -1.442695, %v413_v37 }
 0x1d4   : > { %v826_v40 = vpop.eup %825  ;;  %v1195_v41 = vadd.f32 1.0, %v824_v38  ;;  %v750_v42 = vmul.f32 -1.442695, %v398_v36 }
 0x1d5   : > { %v828_v43 = vpop.eup %827  ;;  %v1197_v44 = vadd.f32 1.0, %v826_v40  ;;  %831 = vpow2.f32 %v752_v39 }
 0x1d6   : > { %v830_v45 = vpop.eup %829  ;;  %833 = vrcp.f32 %v1195_v41  ;;  %v448_v48 = vmul.f32 %v828_v43, %v439_v28  ;;  %vm453_vm3 = vweird.f32 %v828_v43  ;;  %v503_v25 = vand.u32 2147483648, %v1195_v41 }
 0x1d7   : > { %835 = vrcp.f32 %v1197_v44  ;;  %v1204_v49 = vadd.f32 1.0, %v830_v45  ;;  %vm454_vm5 = vmor %vm452_vm4, %vm453_vm3  ;;  %v473_v24 = vand.u32 2147483648, %v1197_v44  ;;  %v471_v30 = vand.u32 2147483647, %v1197_v44 }
 0x1d8   : > { %837 = vpow2.f32 %v750_v42  ;;  %v406_v50 = vpop.f32.mrf.mxu2  ;;  %v449_v51 = vsub.f32 1.0, %v448_v48  ;;  %v501_v31 = vand.u32 2147483647, %v1195_v41  ;;  %vm467_vm9 = vweird.f32 %v1197_v44 }
 0x1d9   : > { %v407_v52 = vadd.f32 %v406_v50, %v342_v47  ;;  %839 = vpow2.f32 %v755_v46  ;;  %vm497_vm10 = vweird.f32 %v1195_v41  ;;  %v474_v37 = vor.u32 1.1754944e-38, %v473_v24 }
 0x1da   : > { %v450_v54 = vmul.f32 %v828_v43, %v449_v51  ;;  %841 = vrcp.f32 %v1204_v49  ;;  %v504_v40 = vor.u32 1.1754944e-38, %v503_v25  ;;  %vm472_vm13 = vcmp.eq.f32.partialorder %v471_v30, 8.507059e+37 }
 0x1db   : > { %v832_v56 = vpop.eup %831  ;;  %v753_v57 = vmul.f32 -1.442695, %v407_v52  ;;  %vm502_vm14 = vcmp.eq.f32.partialorder %v501_v31, 8.507059e+37  ;;  %vm542_vm1 = vweird.f32 %v1204_v49  ;;  %v546_v24 = vand.u32 2147483647, %v1204_v49 }
 0x1dc   : > { %v834_v58 = vpop.eup %833  ;;  %v1207_v59 = vadd.f32 1.0, %v832_v56  ;;  %v451_v60 = vadd.f32 %v828_v43, %v450_v54 }
 0x1dd   : > { %v836_v61 = vpop.eup %835  ;;  %843 = vpow2.f32 %v753_v57  ;;  %v493_v63 = vmul.f32 %v834_v58, %v1195_v41  ;;  %vm498_vm7 = vweird.f32 %v834_v58 }
 0x1de   : > { %v838_v3 = vpop.eup %837  ;;  %845 = vrcp.f32 %v1207_v59  ;;  %v455_v5 = vsel %vm454_vm5, %v828_v43, %v451_v60  ;;  %v463_v8 = vmul.f32 %v836_v61, %v1197_v44  ;;  %vm468_vm8 = vweird.f32 %v836_v61  ;;  %vm499_vm11 = vmor %vm497_vm10, %vm498_vm7 }
 0x1df   : > { %v1212_v15 = vadd.f32 1.0, %v838_v3  ;;  %v460_v16 = vsel %vm457_vm6, %v459_v62, %v455_v5  ;;  %v494_v17 = vsub.f32 1.0, %v493_v63  ;;  %v840_v22 = vpop.eup %839  ;;  %vm469_vm12 = vmor %vm467_vm9, %vm468_vm8  ;;  %v518_v51 = vand.u32 2147483648, %v1207_v59 }
 0x1e0   : > { %569 = vperm.xlu2 %818, %v460_v16   ;;  %v464_v23 = vsub.f32 1.0, %v463_v8  ;;  %v1216_v26 = vpop.eup %841  ;;  %v1219_v27 = vadd.f32 1.0, %v840_v22  ;;  %v516_v53 = vand.u32 2147483647, %v1207_v59  ;;  %vm512_vm0 = vweird.f32 %v1207_v59 }
 0x1e1   : > { %847 = vrcp.f32 %v1212_v15  ;;  %v495_v28 = vmul.f32 %v834_v58, %v494_v17  ;;  %v538_v38 = vmul.f32 %v1216_v26, %v1204_v49  ;;  %v488_v55 = vand.u32 2147483648, %v1212_v15 }
 0x1e2   : > { %v465_v29 = vmul.f32 %v836_v61, %v464_v23  ;;  %849 = vrcp.f32 %v1219_v27  ;;  %v486_v60 = vand.u32 2147483647, %v1212_v15  ;;  %vm482_vm4 = vweird.f32 %v1212_v15 }
 0x1e3   : > { %v844_v32 = vpop.eup %843  ;;  %v496_v33 = vadd.f32 %v834_v58, %v495_v28  ;;  %v539_v48 = vsub.f32 1.0, %v538_v38  ;;  %v519_v63 = vor.u32 1.1754944e-38, %v518_v51  ;;  %vm517_vm5 = vcmp.eq.f32.partialorder %v516_v53, 8.507059e+37 }
 0x1e4   : > { %v846_v34 = vpop.eup %845  ;;  %v1225_v35 = vadd.f32 1.0, %v844_v32  ;;  %v466_v36 = vadd.f32 %v836_v61, %v465_v29  ;;  %vm543_vm6 = vweird.f32 %v1216_v26  ;;  %v489_v8 = vor.u32 1.1754944e-38, %v488_v55 }
 0x1e5   : > { %v500_v39 = vsel %vm499_vm11, %v834_v58, %v496_v33  ;;  %v508_v42 = vmul.f32 %v846_v34, %v1207_v59  ;;  %vm513_vm15 = vweird.f32 %v846_v34  ;;  %v548_v22 = vand.u32 2147483648, %v1204_v49  ;;  %vm1249_vm9 = vmor %vm542_vm1, %vm543_vm6 }
 0x1e6   : > { %851 = vrcp.f32 %v1225_v35  ;;  %v470_v43 = vsel %vm469_vm12, %v836_v61, %v466_v36  ;;  %v505_v45 = vsel %vm502_vm14, %v504_v40, %v500_v39  ;;  %vm514_vm3 = vmor %vm512_vm0, %vm513_vm15  ;;  %v540_v61 = vmul.f32 %v1216_v26, %v539_v48 }
 0x1e7   : > { %v848_v41 = vpop.eup %847  ;;  %v475_v44 = vsel %vm472_vm13, %v474_v37, %v470_v43  ;;  %v509_v46 = vsub.f32 1.0, %v508_v42  ;;  %vm487_vm8 = vcmp.eq.f32.partialorder %v486_v60, 8.507059e+37  ;;  %v533_v32 = vand.u32 2147483648, %v1225_v35 }
 0x1e8   : > { %574 = vperm.xlu0 %819, %v475_v44   ;;  %584 = vperm.xlu2 %818, %v505_v45   ;;  %v478_v47 = vmul.f32 %v848_v41, %v1212_v15  ;;  %v850_v54 = vpop.eup %849  ;;  %vm483_vm2 = vweird.f32 %v848_v41  ;;  %v541_v15 = vadd.f32 %v1216_v26, %v540_v61  ;;  %v549_v33 = vor.u32 1.1754944e-38, %v548_v22 }
 0x1e9   : > { %v510_v50 = vmul.f32 %v846_v34, %v509_v46  ;;  %v553_v59 = vmul.f32 %v850_v54, %v1219_v27  ;;  %vm484_vm7 = vmor %vm482_vm4, %vm483_vm2  ;;  %vm527_vm11 = vweird.f32 %v1225_v35  ;;  %vm547_vm12 = vcmp.eq.f32.partialorder %v546_v24, 8.507059e+37 }
 0x1ea   : > { %v479_v52 = vsub.f32 1.0, %v478_v47  ;;  %v545_v36 = vsel %vm1249_vm9, %v1216_v26, %v541_v15  ;;  %v534_v38 = vor.u32 1.1754944e-38, %v533_v32  ;;  %vm557_vm15 = vweird.f32 %v1219_v27 }
 0x1eb   : > { %v511_v56 = vadd.f32 %v846_v34, %v510_v50  ;;  %v554_v30 = vsub.f32 1.0, %v553_v59  ;;  %v550_v39 = vsel %vm547_vm12, %v549_v33, %v545_v36  ;;  %vm558_vm0 = vweird.f32 %v850_v54 }
 0x1ec   : > { %v852_v57 = vpop.eup %851  ;;  %v480_v58 = vmul.f32 %v848_v41, %v479_v52  ;;  %v563_v42 = vand.u32 2147483648, %v1219_v27  ;;  %v561_v43 = vand.u32 2147483647, %v1219_v27  ;;  %vm559_vm1 = vmor %vm557_vm15, %vm558_vm0 }
 0x1ed   : > { %v515_v62 = vsel %vm514_vm3, %v846_v34, %v511_v56  ;;  %v523_v3 = vmul.f32 %v852_v57, %v1225_v35  ;;  %vm528_vm10 = vweird.f32 %v852_v57  ;;  %v531_v34 = vand.u32 2147483647, %v1225_v35 }
 0x1ee   : > { %v481_v5 = vadd.f32 %v848_v41, %v480_v58  ;;  %v520_v16 = vsel %vm517_vm5, %v519_v63, %v515_v62  ;;  %vm529_vm13 = vmor %vm527_vm11, %vm528_vm10  ;;  %v555_v37 = vmul.f32 %v850_v54, %v554_v30  ;;  %v564_v26 = vor.u32 1.1754944e-38, %v563_v42 }
 0x1ef   : > { %v524_v17 = vsub.f32 1.0, %v523_v3  ;;  %vm532_vm14 = vcmp.eq.f32.partialorder %v531_v34, 8.507059e+37  ;;  %vm562_vm2 = vcmp.eq.f32.partialorder %v561_v43, 8.507059e+37 }
 0x1f0   : > { %v485_v23 = vsel %vm484_vm7, %v848_v41, %v481_v5  ;;  %589 = vperm.xlu2 %818, %v520_v16   ;;  %v556_v35 = vadd.f32 %v850_v54, %v555_v37 }
 0x1f1   : > { %v490_v25 = vsel %vm487_vm8, %v489_v8, %v485_v23  ;;  %v525_v28 = vmul.f32 %v852_v57, %v524_v17 }
 0x1f2   : > { %579 = vperm.xlu1 %820, %v490_v25   ;;  %v560_v41 = vsel %vm559_vm1, %v850_v54, %v556_v35 }
 0x1f3   : > { %v526_v31 = vadd.f32 %v852_v57, %v525_v28  ;;  %v565_v44 = vsel %vm562_vm2, %v564_v26, %v560_v41 }
 0x1f5   : > { %v530_v49 = vsel %vm529_vm13, %v852_v57, %v526_v31 }
 0x1f6   : > { %v535_v40 = vsel %vm532_vm14, %v534_v38, %v530_v49 }
 0x1f8   : > { %599 = vperm.xlu2 %818, %v550_v39  }
 0x1fa   : > { %594 = vperm.xlu1 %820, %v535_v40  }
 0x202   : > { %604 = vperm.xlu1 %820, %v565_v44  }
 0x23a   : > { %v570_v45 = vpop.permute.xlu2 %569 }
 0x23b   : > { %v607_v46 = vmul.f32 %v570_v45, %v1122_v20  ;;  %v608_v47 = vmul.f32 %v570_v45, %v1124_v21 }
 0x23d   : > { %623 = vst [vmem:[%s1266_s23] sm:$0xff] %v607_v46 }
 0x23e   : > { %624 = vst [vmem:[%s1266_s23 + $0x8] sm:$0xff] %v608_v47 }
 0x242   : > { %v585_v27 = vpop.permute.xlu2 %584 }
 0x243   : > { %v613_v48 = vmul.f32 %v585_v27, %v1094_v6  ;;  %v614_v20 = vmul.f32 %v585_v27, %v1096_v7 }
 0x245   : > { %629 = vst [vmem:[%s1266_s23 + $0x30] sm:$0xff] %v613_v48 }
 0x246   : > { %630 = vst [vmem:[%s1266_s23 + $0x38] sm:$0xff] %v614_v20 }
 0x24a   : > { %v590_v21 = vpop.permute.xlu2 %589 }
 0x24b   : > { %v615_v50 = vmul.f32 %v590_v21, %v1104_v11  ;;  %v616_v51 = vmul.f32 %v590_v21, %v1106_v12 }
 0x24d   : > { %631 = vst [vmem:[%s1266_s23 + $0x40] sm:$0xff] %v615_v50 }
 0x24e   : > { %632 = vst [vmem:[%s1266_s23 + $0x48] sm:$0xff] %v616_v51 }
 0x252   : > { %v600_v52 = vpop.permute.xlu2 %599 }
 0x253   : > { %v619_v53 = vmul.f32 %v600_v52, %v1100_v9  ;;  %v620_v6 = vmul.f32 %v600_v52, %v1102_v10 }
 0x255   : > { %635 = vst [vmem:[%s1266_s23 + $0x60] sm:$0xff] %v619_v53 }
 0x256   : > { %636 = vst [vmem:[%s1266_s23 + $0x68] sm:$0xff] %v620_v6 }
 0x25a   : > { %v575_v7 = vpop.permute.xlu0 %574 }
 0x25b   : > { %v609_v54 = vmul.f32 %v575_v7, %v1118_v18  ;;  %v610_v11 = vmul.f32 %v575_v7, %v1120_v19 }
 0x25d   : > { %625 = vst [vmem:[%s1266_s23 + $0x10] sm:$0xff] %v609_v54 }
 0x25e   : > { %626 = vst [vmem:[%s1266_s23 + $0x18] sm:$0xff] %v610_v11 }
 0x264   : > { %v580_v12 = vpop.permute.xlu1 %579 }
 0x265   : > { %v611_v55 = vmul.f32 %v580_v12, %v1108_v13  ;;  %v612_v56 = vmul.f32 %v580_v12, %v1110_v14 }
 0x267   : > { %627 = vst [vmem:[%s1266_s23 + $0x20] sm:$0xff] %v611_v55 }
 0x268   : > { %628 = vst [vmem:[%s1266_s23 + $0x28] sm:$0xff] %v612_v56 }
 0x26c   : > { %v595_v9 = vpop.permute.xlu1 %594 }
 0x26d   : > { %v617_v10 = vmul.f32 %v595_v9, %v1086_v2  ;;  %v618_v18 = vmul.f32 %v595_v9, %v1090_v4 }
 0x26f   : > { %633 = vst [vmem:[%s1266_s23 + $0x50] sm:$0xff] %v617_v10 }
 0x270   : > { %634 = vst [vmem:[%s1266_s23 + $0x58] sm:$0xff] %v618_v18 }
 0x274   : > { %v605_v13 = vpop.permute.xlu1 %604 }
 0x275   : > { %v621_v14 = vmul.f32 %v605_v13, %v1082_v0  ;;  %v622_v19 = vmul.f32 %v605_v13, %v1084_v1 }
 0x277   : > { %637 = vst [vmem:[%s1266_s23 + $0x70] sm:$0xff] %v621_v14 }
 0x278   : > { %638 = vst [vmem:[%s1266_s23 + $0x78] sm:$0xff] %v622_v19 }
 0x279   : > { %910 = shalt.err (!%p907_p4)
}
 0x27a   : > { %s954_s12 = smov 256   ;;  %s955_s11 = smov 16  }
 0x27b   : > { %769 = dma.vmem_to_hbm [thread:$0]  (%p1036_p11), %s653_s15, 2048, %s655_s16, %s640_s22, %s954_s12, %s954_s12, %s955_s11  }
 0x27c PF: > { %s669_s23 = sand.u32 1, %s937_s18   ;;  %p1345_p7 = scmp.ge.s32.totalorder %s949_s21, 2 }
 0x27d   : > { %s670_s14 = scalar_lea.sflag [#allocation4], %s669_s23 }
 0x27e   : > { %p776_p5 = pnand %p1345_p7, %p1040_p12 }
 0x280   : > { %p777_p8 = pneg %p776_p5 }
 0x282   : > { %932 = dma.done.wait (%p777_p8), %s670_s14, 2048  }
 0x283   : > { %934 = vsyncadd (%p777_p8), %s670_s14, 4294965248  ;;  %p18_p10 = scmp.ge.s32.totalorder %s1011_s24, 4   ;;  %s1346_s18 = smov %s941_s19 }
 0x284   : > { %s1347_s19 = smov %s945_s20  ;;  %s1348_s20 = smov %s1023_s27 }
 0x285   : > { %s1349_s21 = smov %s1011_s24  ;;  %20 = sbr.rel (!%p18_p10) target bundleno = 5 (0x5), region = 85 }
 0x28a   :  { %676 = vsyncpa [#allocation3], 1 }
 0x28b   :  { %678 = vsyncpa [#allocation3 + $0x1], 1 }
 0x28c   :  { %679 = vsyncpa [#allocation4], 1 }
 0x28d   :  { %681 = vsyncpa [#allocation4 + $0x1], 1 }

</bundles_post_ra>
